<compile_context>
chip_gen: v7x
topology: tpu7x:2x2x1
jax: 0.10.0
libtpu: 0.0.40
codegen_flags: <defaults>
</compile_context>

<pallas_src>
import jax
import jax.numpy as jnp
from jax.experimental import pallas as pl
from jax.experimental.pallas import tpu as pltpu


def _make_matmul_kernel(scale_h, kc):
    """scale_w > 1: one one-hot MXU matmul + scale_h lane-slice stores."""

    def kernel(x_ref, rep_ref, o_ref):
        x = x_ref[...]
        rep = rep_ref[...]
        if x.dtype == jnp.float32:
            # Exact 3-way bf16 split: x == p0 + p1 + p2, each piece bf16-exact, so
            # three bf16 x {0,1} MXU passes reproduce x bit-exactly (finite floats).
            p0 = x.astype(jnp.bfloat16)
            r1 = x - p0.astype(jnp.float32)
            p1 = r1.astype(jnp.bfloat16)
            p2 = (r1 - p1.astype(jnp.float32)).astype(jnp.bfloat16)
            acc = jnp.dot(p0, rep, preferred_element_type=jnp.float32)
            acc = acc + jnp.dot(p1, rep, preferred_element_type=jnp.float32)
            acc = acc + jnp.dot(p2, rep, preferred_element_type=jnp.float32)
        else:
            # bfloat16 input: a single bf16 pass is already exact.
            acc = jnp.dot(x, rep, preferred_element_type=jnp.float32)
        y = acc.astype(o_ref.dtype)
        # H-replication outside the matmul: same W-replicated tile stored scale_h
        # times (writeback volume unchanged; MXU work and R size / scale_h).
        for j in range(scale_h):
            o_ref[:, j * kc:(j + 1) * kc] = y

    return kernel


def _make_copy_kernel(scale_h, kc):
    """scale_w == 1: pure copy (no MXU), exact for every bit pattern."""

    def kernel(x_ref, o_ref):
        x = x_ref[...]
        for j in range(scale_h):
            o_ref[:, j * kc:(j + 1) * kc] = x

    return kernel


def _pick_block_rows(m, out_cols, itemsize, row_align, target_bytes=2 << 20):
    """Rows per grid step: ~2 MiB output block, multiple of row_align (or full M),
    capped so the grid has >= 2 steps when possible (v7x megacore sharding)."""
    if m <= row_align:
        return m
    tm = (target_bytes // max(1, out_cols * itemsize)) // row_align * row_align
    tm = max(row_align, tm)
    if m >= 2 * row_align:
        tm = min(tm, max(row_align, (m // 2) // row_align * row_align))
    return max(row_align, min(tm, m))


def upsample_nearest(x_nchw, in_h, in_w, scale_h, scale_w):
    """Nearest-neighbor upsample of an NCHW tensor by integer scale factors."""
    n, c, h, w = x_nchw.shape
    assert (h, w) == (in_h, in_w), "in_h/in_w must match the input spatial dims"
    assert x_nchw.dtype in (jnp.float32, jnp.bfloat16), "float32/bfloat16 only"
    assert scale_h >= 1 and scale_w >= 1
    out_h, out_w = h * scale_h, w * scale_w

    m = n * c * h                 # one row per (n, c, h)
    kc = scale_w * w              # one W-replicated output row
    k = scale_h * kc              # scale_h replicated rows, concatenated

    x2 = x_nchw.reshape(m, w)     # free row-major view, no transpose / extra HBM pass

    itemsize = x_nchw.dtype.itemsize
    row_align = 16 if x_nchw.dtype == jnp.bfloat16 else 8
    tm = _pick_block_rows(m, k, itemsize, row_align)
    grid = (pl.cdiv(m, tm),)

    passes = 3 if x_nchw.dtype == jnp.float32 else 1
    flops = 0 if scale_w == 1 else 2 * m * kc * w * passes
    cost = pl.CostEstimate(flops=flops, transcendentals=0,
                           bytes_accessed=(m * w + m * k) * itemsize)

    compiler_params = pltpu.CompilerParams(
        dimension_semantics=("parallel",),        # shard row chunks across v7x TCs
        vmem_limit_bytes=32 * 1024 * 1024)

    out_shape = jax.ShapeDtypeStruct((m, k), x_nchw.dtype)
    out_spec = pl.BlockSpec((tm, k), lambda i: (i, 0))   # full-width, lane-dense block
    x_spec = pl.BlockSpec((tm, w), lambda i: (i, 0))     # each input row read once

    if scale_w == 1:
        o2 = pl.pallas_call(
            _make_copy_kernel(scale_h, kc),
            out_shape=out_shape, grid=grid,
            in_specs=[x_spec], out_specs=out_spec,
            compiler_params=compiler_params, cost_estimate=cost,
        )(x2)
    else:
        # Constant 0/1 replication matrix: column k of a W-replicated row sources
        # input column k // scale_w.  Shape (W, scale_w*W) — scale_h x smaller than v1.
        src_w = jnp.arange(kc, dtype=jnp.int32) // scale_w
        rep = (src_w[None, :] == jnp.arange(w, dtype=jnp.int32)[:, None]).astype(
            jnp.bfloat16)
        rep_spec = pl.BlockSpec((w, kc), lambda i: (0, 0))   # constant block, fetched once
        o2 = pl.pallas_call(
            _make_matmul_kernel(scale_h, kc),
            out_shape=out_shape, grid=grid,
            in_specs=[x_spec, rep_spec], out_specs=out_spec,
            compiler_params=compiler_params, cost_estimate=cost,
        )(x2, rep)

    # Free row-major reshape: (M, K) -> (N, C, out_h, out_w).
    return o2.reshape(n, c, out_h, out_w)


def _reference(x, scale_h, scale_w):
    return jnp.repeat(jnp.repeat(x, scale_h, axis=2), scale_w, axis=3)


if __name__ == "__main__":
    key = jax.random.PRNGKey(0)
    k0, k1, k2, k3 = jax.random.split(key, 4)

    # Case 1: canonical 2x2 upsample, float32.
    N, C, H, W = 2, 4, 16, 16
    sh, sw = 2, 2
    x = jax.random.normal(k0, (N, C, H, W), dtype=jnp.float32)
    out = jax.block_until_ready(upsample_nearest(x, H, W, sh, sw))
    assert out.shape == (N, C, H * sh, W * sw)
    assert out.dtype == x.dtype
    assert jnp.array_equal(out, _reference(x, sh, sw)), "float32 2x2 mismatch"

    # Case 2: non-square scale (3x2), float32.
    H2, W2, sh2, sw2 = 8, 16, 3, 2
    x2 = jax.random.normal(k1, (N, C, H2, W2), dtype=jnp.float32)
    out2 = jax.block_until_ready(upsample_nearest(x2, H2, W2, sh2, sw2))
    assert jnp.array_equal(out2, _reference(x2, sh2, sw2)), "float32 3x2 mismatch"

    # Case 3: bfloat16 path.
    xb = jax.random.normal(k2, (N, C, H, W), dtype=jnp.float32).astype(jnp.bfloat16)
    outb = jax.block_until_ready(upsample_nearest(xb, H, W, sh, sw))
    assert outb.dtype == jnp.bfloat16
    assert jnp.array_equal(outb, _reference(xb, sh, sw)), "bfloat16 2x2 mismatch"

    # Case 4: H-only upsample (scale_w == 1) exercises the MXU-free copy kernel.
    H4, W4, sh4, sw4 = 8, 16, 2, 1
    x4 = jax.random.normal(k3, (N, C, H4, W4), dtype=jnp.float32)
    out4 = jax.block_until_ready(upsample_nearest(x4, H4, W4, sh4, sw4))
    assert jnp.array_equal(out4, _reference(x4, sh4, sw4)), "float32 2x1 mismatch"

    print("KERNEL_OK")
</pallas_src>

<mosaic_0001>
module attributes {stable_mosaic.version = 11 : i64} {
  func.func @kernel(%arg0: i32, %arg1: memref<64x16xf32, #tpu.memory_space<vmem>>, %arg2: memref<16x32xbf16, #tpu.memory_space<vmem>>, %arg3: memref<64x64xf32, #tpu.memory_space<vmem>>) attributes {dimension_semantics = [#tpu.dimension_semantics<parallel>], iteration_bounds = array<i64: 2>, scalar_prefetch = 0 : i64, scratch_operands = 0 : i64, tpu.core_type = #tpu.core_type<tc>, window_params = [{transform_indices = @transform_0, window_bounds = array<i64: 64, 16>}, {pipeline_mode = #tpu.pipeline_mode<synchronous>, transform_indices = @transform_1, window_bounds = array<i64: 16, 32>}, {transform_indices = @transform_2, window_bounds = array<i64: 64, 64>}]} {
    %c0 = arith.constant 0 : index
    %c0_0 = arith.constant 0 : index
    %0 = vector.load %arg1[%c0, %c0_0] : memref<64x16xf32, #tpu.memory_space<vmem>>, vector<64x16xf32>
    %c0_1 = arith.constant 0 : index
    %c0_2 = arith.constant 0 : index
    %1 = vector.load %arg2[%c0_1, %c0_2] : memref<16x32xbf16, #tpu.memory_space<vmem>>, vector<16x32xbf16>
    %2 = arith.truncf %0 : vector<64x16xf32> to vector<64x16xbf16>
    %3 = arith.extf %2 : vector<64x16xbf16> to vector<64x16xf32>
    %4 = arith.subf %0, %3 : vector<64x16xf32>
    %5 = arith.truncf %4 : vector<64x16xf32> to vector<64x16xbf16>
    %6 = arith.extf %5 : vector<64x16xbf16> to vector<64x16xf32>
    %7 = arith.subf %4, %6 : vector<64x16xf32>
    %8 = arith.truncf %7 : vector<64x16xf32> to vector<64x16xbf16>
    %cst = arith.constant dense<0.000000e+00> : vector<64x32xf32>
    %9 = tpu.matmul %2, %1, %cst {dimension_numbers = #tpu.dot_dimension_numbers<[1], [0], [0], [1], [0, 0, 1, 1], [], []>} : vector<64x16xbf16>, vector<16x32xbf16>, vector<64x32xf32> -> vector<64x32xf32>
    %cst_3 = arith.constant dense<0.000000e+00> : vector<64x32xf32>
    %10 = tpu.matmul %5, %1, %cst_3 {dimension_numbers = #tpu.dot_dimension_numbers<[1], [0], [0], [1], [0, 0, 1, 1], [], []>} : vector<64x16xbf16>, vector<16x32xbf16>, vector<64x32xf32> -> vector<64x32xf32>
    %11 = arith.addf %9, %10 : vector<64x32xf32>
    %cst_4 = arith.constant dense<0.000000e+00> : vector<64x32xf32>
    %12 = tpu.matmul %8, %1, %cst_4 {dimension_numbers = #tpu.dot_dimension_numbers<[1], [0], [0], [1], [0, 0, 1, 1], [], []>} : vector<64x16xbf16>, vector<16x32xbf16>, vector<64x32xf32> -> vector<64x32xf32>
    %13 = arith.addf %11, %12 : vector<64x32xf32>
    %c0_5 = arith.constant 0 : index
    %c0_6 = arith.constant 0 : index
    %14 = vector.load %arg3[%c0_5, %c0_6] : memref<64x64xf32, #tpu.memory_space<vmem>>, vector<64x32xf32>
    tpu.vector_store %arg3[%c0_5, %c0_6], %13 {strides = array<i32>} : memref<64x64xf32, #tpu.memory_space<vmem>>, vector<64x32xf32>,
    %c0_7 = arith.constant 0 : index
    %c32 = arith.constant 32 : index
    %15 = vector.load %arg3[%c0_7, %c32] : memref<64x64xf32, #tpu.memory_space<vmem>>, vector<64x32xf32>
    tpu.vector_store %arg3[%c0_7, %c32], %13 {strides = array<i32>} : memref<64x64xf32, #tpu.memory_space<vmem>>, vector<64x32xf32>,
    return
  }
  func.func @transform_0(%arg0: i32) -> (i32, i32) {
    %c0_i32 = arith.constant 0 : i32
    %c0_i32_0 = arith.constant 0 : i32
    return %arg0, %c0_i32 : i32, i32
  }
  func.func @transform_1(%arg0: i32) -> (i32, i32) {
    %c0_i32 = arith.constant 0 : i32
    %c0_i32_0 = arith.constant 0 : i32
    %c0_i32_1 = arith.constant 0 : i32
    return %c0_i32, %c0_i32_0 : i32, i32
  }
  func.func @transform_2(%arg0: i32) -> (i32, i32) {
    %c0_i32 = arith.constant 0 : i32
    %c0_i32_0 = arith.constant 0 : i32
    return %arg0, %c0_i32 : i32, i32
  }
}

</mosaic_0001>

<bundles_post_ra>
// kernel: tpu_custom_call.1
= control target key start
LH: loop header
LB: loop body
LE: loop exit
PB: predicated region body
PF: predicated region fallthrough
CT: control target
= control target key end

     0   :  { %s675_s9 = smov 0   ;;  %s748_s0 = inlined_call_operand.vmem [shape: f32[128,16], index: 0, kind: input, shape index: {}]   ;;  %s749_s1 = inlined_call_operand.vmem [shape: bf16[16,32], index: 1, kind: input, shape index: {}]   ;;  %s750_s2 = inlined_call_operand.vmem [shape: f32[128,64], index: 2, kind: output, shape index: {}]  }
   0x1 LB: > { %s554_s10 = sadd.s32 4294967295, %s657_s9   ;;  %p558_p0 = scmp.ge.s32.totalorder %s657_s9, 1  ;;  %s657_s9 = sphi %s675_s9, %s12_s9  }
   0x2   : > { %p113_p1 = scmp.lt.s32.totalorder %s657_s9, 3 }
   0x4   : > { %p114_p2 = pnand %p558_p0, %p113_p1 }
   0x5   : > { %v650_v0 = vld [vmem:[%s749_s1] sm:$0xff] (!%p114_p2)   ;;  %s559_s13 = sshll.u32 (!%p114_p2), %s554_s10, 3  ;;  %vm208_vm0 = vcmask (!%p114_p2), 130048   ;;  %vm448_vm1 = vcmask (!%p114_p2), 261120   ;;  %s659_s21 = smov (!%p114_p2), 32   ;;  %vm489_vm2 = vcmask (!%p114_p2), 523520  }
   0x6   : > { %117 = sbr.rel (%p114_p2) target bundleno = 383 (0x17f), region = 28  ;;  %p136_p3 = scmp.lt.s32.totalorder (!%p114_p2), %s559_s13, 15  ;;  %603 = vmatprep.subr.bf16.mxu0 (!%p114_p2), %v650_v0  ;;  %593 = vmatprep.subr.bf16.mxu1 (!%p114_p2), %v650_v0 }
   0x7   : > { %604 = vmatpush3.bf16.msra.mxu0 (!%p114_p2), %v650_v0  ;;  %594 = vmatpush3.bf16.msra.mxu1 (!%p114_p2), %v650_v0 }
   0x8   : > { %623 = vmatprep.subr.bf16.mxu1 (!%p114_p2), %v650_v0  ;;  %613 = vmatprep.subr.bf16.mxu0 (!%p114_p2), %v650_v0 }
   0xd   : > { %s752_s13 = smov (!%p136_p3, %s559_s13), 15 }
   0xe   : > { %s560_s14 = sshll.u32 %s752_s13, 3 }
   0xf   : > { %s139_s17 = scalar_lea.vmem %s748_s0, %s560_s14  ;;  %s711_s20 = scalar_lea.vmem %s750_s2, %s560_s14 }
  0x10   : > { %v148_v1 = vld [vmem:[%s139_s17] sm:$0xff]  ;;  %v149_v2 = vld [vmem:[%s139_s17 + $0x8] sm:$0xff]  ;;  %v150_v3 = vld [vmem:[%s139_s17 + $0x10] sm:$0xff] }
  0x11   : > { %v158_v4 = vpack.c.bf16 %v149_v2, %v148_v1  ;;  %v151_v5 = vld [vmem:[%s139_s17 + $0x18] sm:$0xff]  ;;  %v152_v6 = vld [vmem:[%s139_s17 + $0x20] sm:$0xff]  ;;  %v153_v7 = vld [vmem:[%s139_s17 + $0x28] sm:$0xff] }
  0x12   : > { %v159_v8 = vpack.c.bf16 %v151_v5, %v150_v3  ;;  %v160_v9 = vpack.c.bf16 %v153_v7, %v152_v6  ;;  %v154_v10 = vld [vmem:[%s139_s17 + $0x30] sm:$0xff]  ;;  %v155_v11 = vld [vmem:[%s139_s17 + $0x38] sm:$0xff] }
  0x13   : > { %605 = vmatprep.mubr.msk.bf16.mxu0 %vm208_vm0, %v158_v4  ;;  %v162_v12 = vunpack.c.l.bf16 %v158_v4  ;;  %v163_v13 = vunpack.c.h.bf16 %v158_v4  ;;  %v161_v14 = vpack.c.bf16 %v155_v11, %v154_v10 }
  0x14   : > { %606 = vmatmul.mubr.msk.bf16.vlgmr.msra.gmra.mrb[0].mxu0 %vm208_vm0, %v159_v8  ;;  %v164_v15 = vunpack.c.l.bf16 %v159_v8  ;;  %v165_v16 = vunpack.c.h.bf16 %v159_v8  ;;  %v166_v17 = vunpack.c.l.bf16 %v160_v9  ;;  %v167_v18 = vunpack.c.h.bf16 %v160_v9 }
  0x15   : > { %v170_v19 = vsub.f32 %v148_v1, %v162_v12  ;;  %v171_v20 = vsub.f32 %v149_v2, %v163_v13  ;;  %614 = vmatpush3.bf16.msra.mxu0 %v650_v0  ;;  %v168_v21 = vunpack.c.l.bf16 %v161_v14  ;;  %v169_v22 = vunpack.c.h.bf16 %v161_v14 }
  0x16   : > { %v172_v23 = vsub.f32 %v150_v3, %v164_v15  ;;  %v173_v24 = vsub.f32 %v151_v5, %v165_v16  ;;  %v174_v25 = vsub.f32 %v152_v6, %v166_v17  ;;  %v175_v26 = vsub.f32 %v153_v7, %v167_v18 }
  0x17   : > { %v178_v27 = vpack.c.bf16 %v171_v20, %v170_v19  ;;  %v176_v28 = vsub.f32 %v154_v10, %v168_v21  ;;  %v177_v29 = vsub.f32 %v155_v11, %v169_v22 }
  0x18   : > { %v179_v30 = vpack.c.bf16 %v173_v24, %v172_v23  ;;  %v180_v31 = vpack.c.bf16 %v175_v26, %v174_v25 }
  0x19   : > { %v182_v32 = vunpack.c.l.bf16 %v178_v27  ;;  %v183_v33 = vunpack.c.h.bf16 %v178_v27  ;;  %595 = vmatprep.mubr.msk.bf16.mxu1 %vm208_vm0, %v178_v27  ;;  %v181_v34 = vpack.c.bf16 %v177_v29, %v176_v28 }
  0x1a   : > { %v184_v35 = vunpack.c.l.bf16 %v179_v30  ;;  %v185_v36 = vunpack.c.h.bf16 %v179_v30  ;;  %596 = vmatmul.mubr.msk.bf16.vlgmr.msra.gmra.mrb[0].mxu1 %vm208_vm0, %v179_v30  ;;  %v186_v37 = vunpack.c.l.bf16 %v180_v31  ;;  %v187_v38 = vunpack.c.h.bf16 %v180_v31 }
  0x1b   : > { %v190_v39 = vsub.f32 %v170_v19, %v182_v32  ;;  %v191_v40 = vsub.f32 %v171_v20, %v183_v33  ;;  %624 = vmatpush3.bf16.msra.mxu1 %v650_v0  ;;  %599 = vmatprep.mubr.msk.bf16.mxu1 %vm208_vm0, %v180_v31  ;;  %v188_v41 = vunpack.c.l.bf16 %v181_v34  ;;  %v189_v42 = vunpack.c.h.bf16 %v181_v34 }
  0x1c   : > { %v192_v43 = vsub.f32 %v172_v23, %v184_v35  ;;  %v193_v44 = vsub.f32 %v173_v24, %v185_v36  ;;  %v194_v45 = vsub.f32 %v174_v25, %v186_v37  ;;  %v195_v46 = vsub.f32 %v175_v26, %v187_v38 }
  0x1d   : > { %v198_v47 = vpack.c.bf16 %v191_v40, %v190_v39  ;;  %v196_v50 = vsub.f32 %v176_v28, %v188_v41  ;;  %v197_v51 = vsub.f32 %v177_v29, %v189_v42 }
  0x1e   : > { %v199_v48 = vpack.c.bf16 %v193_v44, %v192_v43  ;;  %v200_v49 = vpack.c.bf16 %v195_v46, %v194_v45 }
  0x1f   : > { %615 = vmatprep.mubr.msk.bf16.mxu0 %vm208_vm0, %v198_v47  ;;  %v201_v52 = vpack.c.bf16 %v197_v51, %v196_v50 }
  0x20   : > { %616 = vmatmul.mubr.msk.bf16.vlgmr.msra.gmra.mrb[0].mxu0 %vm208_vm0, %v199_v48 }
  0x21   : > { %619 = vmatprep.mubr.msk.bf16.mxu0 %vm208_vm0, %v200_v49 }
  0x22   : > { %600 = vmatmul.mubr.msk.bf16.gmra.mrb[4].mxu1 %vm208_vm0, %v181_v34 }
  0x23   : > { %609 = vmatprep.mubr.msk.bf16.mxu1 %vm208_vm0, %v160_v9 }
  0x28   : > { %620 = vmatmul.mubr.msk.bf16.gmra.mrb[4].mxu0 %vm208_vm0, %v201_v52 }
  0x2e   : > { %610 = vmatmul.mubr.msk.bf16.vlgmr.msra.gmra.mrb[4].mxu1 %vm208_vm0, %v161_v14 }
  0xed   : > { %v597_v53 = vpop.f32.mrb[0].mxu1 }
  0xee   : > { %v255_v54 = vpop.f32.mrb[1].mxu1 }
  0xef   : > { %v598_v55 = vpop.f32.mrb[2].mxu1 }
  0xf0   : > { %v258_v56 = vpop.f32.mrb[3].mxu1 }
  0xf3   : > { %v617_v57 = vpop.f32.mrb[0].mxu0 }
  0xf4   : > { %v625_v58 = vadd.f32 %v617_v57, %v597_v53  ;;  %v409_v59 = vpop.f32.mrb[1].mxu0 }
  0xf5   : > { %v626_v60 = vadd.f32 %v409_v59, %v255_v54  ;;  %v618_v61 = vpop.f32.mrb[2].mxu0 }
  0xf6   : > { %451 = vst.msk [vmem:[%s711_s20 + $0x10] sm:$0xff] %vm448_vm1, %v625_v58  ;;  %v627_v62 = vadd.f32 %v618_v61, %v598_v55  ;;  %469 = vrot.lane.b32.xlu1 %v625_v58, %s659_s21  ;;  %v412_v63 = vpop.f32.mrb[3].mxu0 }
  0xf7   : > { %449 = vst.msk [vmem:[%s711_s20] sm:$0xff] %vm448_vm1, %v626_v60  ;;  %v628_v0 = vadd.f32 %v412_v63, %v258_v56  ;;  %465 = vrot.lane.b32.xlu0 %v626_v60, %s659_s21 }
  0xf8   : > { %452 = vst.msk [vmem:[%s711_s20 + $0x18] sm:$0xff] %vm448_vm1, %v627_v62 }
  0xf9   : > { %450 = vst.msk [vmem:[%s711_s20 + $0x8] sm:$0xff] %vm448_vm1, %v628_v0 }
  0xfa   : > { %471 = vrot.lane.b32.xlu1 %v627_v62, %s659_s21 }
  0xfb   : > { %467 = vrot.lane.b32.xlu0 %v628_v0, %s659_s21  ;;  %v621_v1 = vpop.f32.mrb[4].mxu0 }
  0xfc   : > { %v425_v2 = vpop.f32.mrb[5].mxu0 }
  0xfd   : > { %v622_v3 = vpop.f32.mrb[6].mxu0 }
  0xfe   : > { %v428_v4 = vpop.f32.mrb[7].mxu0 }
 0x101   : > { %v611_v5 = vpop.f32.mrb[4].mxu1 }
 0x102   : > { %v629_v6 = vadd.f32 %v621_v1, %v611_v5  ;;  %v348_v7 = vpop.f32.mrb[5].mxu1 }
 0x103   : > { %v630_v8 = vadd.f32 %v425_v2, %v348_v7  ;;  %v612_v9 = vpop.f32.mrb[6].mxu1 }
 0x104   : > { %455 = vst.msk [vmem:[%s711_s20 + $0x30] sm:$0xff] %vm448_vm1, %v629_v6  ;;  %v631_v10 = vadd.f32 %v622_v3, %v612_v9  ;;  %v351_v11 = vpop.f32.mrb[7].mxu1 }
 0x105   : > { %453 = vst.msk [vmem:[%s711_s20 + $0x20] sm:$0xff] %vm448_vm1, %v630_v8  ;;  %v632_v12 = vadd.f32 %v428_v4, %v351_v11  ;;  %473 = vrot.lane.b32.xlu0 %v630_v8, %s659_s21 }
 0x106   : > { %456 = vst.msk [vmem:[%s711_s20 + $0x38] sm:$0xff] %vm448_vm1, %v631_v10 }
 0x107   : > { %454 = vst.msk [vmem:[%s711_s20 + $0x28] sm:$0xff] %vm448_vm1, %v632_v12  ;;  %475 = vrot.lane.b32.xlu1 %v632_v12, %s659_s21 }
 0x109   : > { %477 = vrot.lane.b32.xlu0 %v629_v6, %s659_s21 }
 0x10b   : > { %479 = vrot.lane.b32.xlu1 %v631_v10, %s659_s21 }
 0x168   : > { %v470_v13 = vpop.permute.xlu1 %469 }
 0x169   : > { %492 = vst.msk [vmem:[%s711_s20 + $0x10] sm:$0xff] %vm489_vm2, %v470_v13  ;;  %v466_v14 = vpop.permute.xlu0 %465 }
 0x16a   : > { %490 = vst.msk [vmem:[%s711_s20] sm:$0xff] %vm489_vm2, %v466_v14 }
 0x16c   : > { %v472_v15 = vpop.permute.xlu1 %471 }
 0x16d   : > { %493 = vst.msk [vmem:[%s711_s20 + $0x18] sm:$0xff] %vm489_vm2, %v472_v15  ;;  %v468_v16 = vpop.permute.xlu0 %467 }
 0x16e   : > { %491 = vst.msk [vmem:[%s711_s20 + $0x8] sm:$0xff] %vm489_vm2, %v468_v16 }
 0x177   : > { %v474_v17 = vpop.permute.xlu0 %473 }
 0x178   : > { %494 = vst.msk [vmem:[%s711_s20 + $0x20] sm:$0xff] %vm489_vm2, %v474_v17 }
 0x179   : > { %v476_v18 = vpop.permute.xlu1 %475 }
 0x17a   : > { %495 = vst.msk [vmem:[%s711_s20 + $0x28] sm:$0xff] %vm489_vm2, %v476_v18 }
 0x17b   : > { %v478_v19 = vpop.permute.xlu0 %477 }
 0x17c   : > { %496 = vst.msk [vmem:[%s711_s20 + $0x30] sm:$0xff] %vm489_vm2, %v478_v19 }
 0x17d   : > { %v480_v20 = vpop.permute.xlu1 %479 }
 0x17e   : > { %497 = vst.msk [vmem:[%s711_s20 + $0x38] sm:$0xff] %vm489_vm2, %v480_v20 }
 0x17f PF: > { %s12_s9 = sadd.s32 1, %s657_s9  }
 0x180   : > { %p9_p4 = scmp.ge.s32.totalorder %s12_s9, 4  }
 0x182   :  { %11 = sbr.rel (!%p9_p4) target bundleno = 1 (0x1), region = 58 }

</bundles_post_ra>
